<compile_context>
chip_gen: v7x
topology: tpu7x:2x2x1
jax: 0.10.0
libtpu: 0.0.40
codegen_flags: <defaults>
</compile_context>

<pallas_src>
import jax
import jax.numpy as jnp
from jax.experimental import pallas as pl
from jax.experimental.pallas import tpu as pltpu


# --------------------------------------------------------------------------- #
# Kernels
# --------------------------------------------------------------------------- #
def _merge_scale_kernel(att_ref, xt_ref, merge_ref, soft_ref, scale_ref):
    # att_ref:   (S, TN)     -- rows (B*T) on the lane axis (dense)
    # xt_ref:    (S, TN, H)  -- H on the lane axis
    # merge_ref: (TN, H)
    # soft_ref:  (S, TN)
    # scale_ref: (S, TN, H)
    a = att_ref[...].astype(jnp.float32)                              # (S, TN)
    m = jnp.max(a, axis=0, keepdims=True)
    e = jnp.exp(a - m)
    p = e * pl.reciprocal(jnp.sum(e, axis=0, keepdims=True), approx=False)
    soft_ref[...] = p.astype(soft_ref.dtype)                          # lane-dense store

    xt = xt_ref[...]                                                  # native dtype (bf16 stays bf16)
    w = p.astype(xt.dtype)[:, :, None]                                # (S, TN, 1)
    sc = w * xt                                                       # single broadcast multiply
    scale_ref[...] = sc
    merge_ref[...] = jnp.sum(sc.astype(jnp.float32), axis=0).astype(merge_ref.dtype)


def _merge_only_kernel(att_ref, xt_ref, merge_ref, soft_ref):
    a = att_ref[...].astype(jnp.float32)
    m = jnp.max(a, axis=0, keepdims=True)
    e = jnp.exp(a - m)
    p = e * pl.reciprocal(jnp.sum(e, axis=0, keepdims=True), approx=False)
    soft_ref[...] = p.astype(soft_ref.dtype)

    xt = xt_ref[...]
    w = p.astype(xt.dtype)[:, :, None]
    merge_ref[...] = jnp.sum((w * xt).astype(jnp.float32), axis=0).astype(merge_ref.dtype)


# --------------------------------------------------------------------------- #
# Tiling
# --------------------------------------------------------------------------- #
def _pick_row_tile(n_rows, n_sensors, hidden, itemsize, with_scale,
                   vmem_budget_bytes=24 << 20):
    """Row tile over the folded B*T axis.

    Must be a multiple of 128 (it is the lane axis of the att/soft blocks)
    unless it covers the whole array.  Sized so the double-buffered VMEM
    footprint of one grid step stays within a budget safe on v5e/v6e (128 MiB)
    and v7x (64 MiB), and kept small enough to leave >= 2 grid steps for
    pipelining / megacore sharding when the problem allows it.
    """
    if n_rows <= 128:
        return n_rows
    per_row = ((2 if with_scale else 1) * n_sensors * hidden + hidden) * itemsize
    per_row += 2 * n_sensors * 4                      # att + soft blocks (f32 upper bound)
    max_rows = max(128, vmem_budget_bytes // (2 * per_row))   # 2x: double buffering
    tile = max(128, min(2048, (max_rows // 128) * 128))
    while tile > 128 and tile >= n_rows:              # prefer >= 2 grid steps
        tile = max(128, ((tile // 2) // 128) * 128)
    return tile


# --------------------------------------------------------------------------- #
# Wrapper (mirrors merge_module(num_sensors, disabled).forward)
# --------------------------------------------------------------------------- #
def merge_forward(x_attention, x_transform, num_sensors, disabled=(), want_scale=True):
    """x_attention: list of (B, T, 1); x_transform: list of (B, T, H).

    Returns (merge, split_attention, scale) like the PyTorch module.  With
    want_scale=False, `scale` is None and the (S, B, T, H)-sized output is not
    materialized (halves HBM traffic of this bandwidth-bound op).
    """
    x_attention = list(x_attention)
    x_transform = list(x_transform)
    disabled = sorted(set(disabled))
    if disabled:
        remainder = sorted(set(range(num_sensors)) ^ set(disabled))
        for idx in sorted(disabled, reverse=True):
            del x_attention[idx], x_transform[idx]

    s_active = len(x_attention)
    B, T, _ = x_attention[0].shape
    H = x_transform[0].shape[-1]
    N = B * T

    # Sensor-leading, lane-dense layouts.
    att = jnp.stack([a.reshape(N) for a in x_attention], axis=0)       # (S, N)
    xt = jnp.stack([t.reshape(N, H) for t in x_transform], axis=0)     # (S, N, H)
    att_dtype = att.dtype
    out_dtype = xt.dtype

    TN = _pick_row_tile(N, s_active, H, jnp.dtype(out_dtype).itemsize, want_scale)
    grid = (pl.cdiv(N, TN),)

    in_specs = [
        pl.BlockSpec((s_active, TN), lambda i: (0, i)),
        pl.BlockSpec((s_active, TN, H), lambda i: (0, i, 0)),
    ]
    merge_spec = pl.BlockSpec((TN, H), lambda i: (i, 0))
    soft_spec = pl.BlockSpec((s_active, TN), lambda i: (0, i))

    compiler_params = pltpu.CompilerParams(
        dimension_semantics=("parallel",),
        vmem_limit_bytes=48 << 20,   # < v7x physical 64 MiB, comfortably > default scoped
    )

    if want_scale:
        merge2, soft2, scale2 = pl.pallas_call(
            _merge_scale_kernel,
            out_shape=(
                jax.ShapeDtypeStruct((N, H), out_dtype),
                jax.ShapeDtypeStruct((s_active, N), att_dtype),
                jax.ShapeDtypeStruct((s_active, N, H), out_dtype),
            ),
            grid=grid,
            in_specs=in_specs,
            out_specs=(merge_spec, soft_spec,
                       pl.BlockSpec((s_active, TN, H), lambda i: (0, i, 0))),
            compiler_params=compiler_params,
        )(att, xt)
    else:
        merge2, soft2 = pl.pallas_call(
            _merge_only_kernel,
            out_shape=(
                jax.ShapeDtypeStruct((N, H), out_dtype),
                jax.ShapeDtypeStruct((s_active, N), att_dtype),
            ),
            grid=grid,
            in_specs=in_specs,
            out_specs=(merge_spec, soft_spec),
            compiler_params=compiler_params,
        )(att, xt)
        scale2 = None

    merge = merge2.reshape(B, T, H)
    split_attention = [soft2[s].reshape(B, T, 1) for s in range(s_active)]
    scale = [scale2[s].reshape(B, T, H) for s in range(s_active)] if want_scale else None

    if disabled:
        zero_att = jnp.zeros_like(split_attention[0])
        full_att = [zero_att] * num_sensors
        for a, idx in zip(split_attention, remainder):
            full_att[idx] = a
        split_attention = full_att
        if want_scale:
            zero_sc = jnp.zeros_like(scale[0])
            full_sc = [zero_sc] * num_sensors
            for sc, idx in zip(scale, remainder):
                full_sc[idx] = sc
            scale = full_sc

    return merge, split_attention, scale


# --------------------------------------------------------------------------- #
# Pure-JAX reference + tests
# --------------------------------------------------------------------------- #
def _reference(x_attention, x_transform):
    att = jnp.concatenate(x_attention, axis=-1)
    p = jax.nn.softmax(att.astype(jnp.float32), axis=-1).astype(att.dtype)
    scale = [p[:, :, s:s + 1] * x_transform[s] for s in range(len(x_transform))]
    merge = sum(scale)
    split = [p[:, :, s:s + 1] for s in range(len(x_transform))]
    return merge, split, scale


if __name__ == "__main__":
    num_sensors = 4
    B, T, H = 2, 8, 32

    key = jax.random.PRNGKey(0)
    keys = jax.random.split(key, 2 * num_sensors)
    x_attention = [jax.random.normal(keys[i], (B, T, 1), dtype=jnp.float32)
                   for i in range(num_sensors)]
    x_transform = [jax.random.normal(keys[num_sensors + i], (B, T, H), dtype=jnp.float32)
                   for i in range(num_sensors)]

    # 1) Full path (merge + split_attention + scale) — matches the torch module.
    merge, split_attention, scale = merge_forward(x_attention, x_transform, num_sensors)
    jax.block_until_ready(merge)

    ref_merge, ref_att, ref_scale = _reference(x_attention, x_transform)
    assert jnp.allclose(merge, ref_merge, atol=1e-5, rtol=1e-5)
    for a, b in zip(split_attention, ref_att):
        assert jnp.allclose(a, b, atol=1e-5, rtol=1e-5)
    for a, b in zip(scale, ref_scale):
        assert jnp.allclose(a, b, atol=1e-5, rtol=1e-5)

    # 2) merge-only path (scale output skipped -> ~half the HBM traffic).
    merge2, split2, _ = merge_forward(x_attention, x_transform, num_sensors,
                                      want_scale=False)
    jax.block_until_ready(merge2)
    assert jnp.allclose(merge2, ref_merge, atol=1e-5, rtol=1e-5)
    for a, b in zip(split2, ref_att):
        assert jnp.allclose(a, b, atol=1e-5, rtol=1e-5)

    # 3) Disabled-sensor plumbing.
    merged_d, att_d, scale_d = merge_forward(x_attention, x_transform, num_sensors,
                                             disabled=[1])
    jax.block_until_ready(merged_d)
    active = [0, 2, 3]
    ref_md, ref_ad, ref_sd = _reference([x_attention[i] for i in active],
                                        [x_transform[i] for i in active])
    assert jnp.allclose(merged_d, ref_md, atol=1e-5, rtol=1e-5)
    assert jnp.allclose(att_d[1], 0.0) and jnp.allclose(scale_d[1], 0.0)
    for i, idx in enumerate(active):
        assert jnp.allclose(att_d[idx], ref_ad[i], atol=1e-5, rtol=1e-5)
        assert jnp.allclose(scale_d[idx], ref_sd[i], atol=1e-5, rtol=1e-5)

    # 4) Larger, multi-tile grid (exercises 512-row lane-dense tiles + pipelining).
    B2, T2, H2 = 4, 256, 128
    keys2 = jax.random.split(jax.random.PRNGKey(1), 2 * num_sensors)
    xa2 = [jax.random.normal(keys2[i], (B2, T2, 1), dtype=jnp.float32)
           for i in range(num_sensors)]
    xt2 = [jax.random.normal(keys2[num_sensors + i], (B2, T2, H2), dtype=jnp.float32)
           for i in range(num_sensors)]
    m3, a3, s3 = merge_forward(xa2, xt2, num_sensors)
    jax.block_until_ready(m3)
    rm3, ra3, rs3 = _reference(xa2, xt2)
    assert jnp.allclose(m3, rm3, atol=1e-4, rtol=1e-4)
    assert jnp.allclose(a3[0], ra3[0], atol=1e-5, rtol=1e-5)
    assert jnp.allclose(s3[2], rs3[2], atol=1e-4, rtol=1e-4)

    print("KERNEL_OK")
</pallas_src>

<mosaic_0001>
module attributes {stable_mosaic.version = 11 : i64} {
  func.func @_merge_scale_kernel(%arg0: i32, %arg1: memref<4x16xf32, #tpu.memory_space<vmem>>, %arg2: memref<4x16x32xf32, #tpu.memory_space<vmem>>, %arg3: memref<16x32xf32, #tpu.memory_space<vmem>>, %arg4: memref<4x16xf32, #tpu.memory_space<vmem>>, %arg5: memref<4x16x32xf32, #tpu.memory_space<vmem>>) attributes {dimension_semantics = [#tpu.dimension_semantics<parallel>], iteration_bounds = array<i64: 1>, scalar_prefetch = 0 : i64, scratch_operands = 0 : i64, tpu.core_type = #tpu.core_type<tc>, window_params = [{transform_indices = @transform_0, window_bounds = array<i64: 4, 16>}, {transform_indices = @transform_1, window_bounds = array<i64: 4, 16, 32>}, {transform_indices = @transform_2, window_bounds = array<i64: 16, 32>}, {transform_indices = @transform_3, window_bounds = array<i64: 4, 16>}, {transform_indices = @transform_4, window_bounds = array<i64: 4, 16, 32>}]} {
    %c0 = arith.constant 0 : index
    %c0_0 = arith.constant 0 : index
    %0 = vector.load %arg1[%c0, %c0_0] : memref<4x16xf32, #tpu.memory_space<vmem>>, vector<4x16xf32>
    %cst = arith.constant dense<0xFF800000> : vector<16xf32>
    %1 = vector.multi_reduction <maximumf>, %0, %cst [0] : vector<4x16xf32> to vector<16xf32>
    %2 = vector.shape_cast %1 : vector<16xf32> to vector<1x16xf32>
    %3 = vector.broadcast %2 : vector<1x16xf32> to vector<4x16xf32>
    %4 = arith.subf %0, %3 : vector<4x16xf32>
    %5 = math.exp %4 : vector<4x16xf32>
    %cst_1 = arith.constant dense<0.000000e+00> : vector<16xf32>
    %6 = vector.multi_reduction <add>, %5, %cst_1 [0] : vector<4x16xf32> to vector<16xf32>
    %7 = vector.shape_cast %6 : vector<16xf32> to vector<1x16xf32>
    %8 = tpu.reciprocal %7 : vector<1x16xf32> -> vector<1x16xf32>
    %9 = vector.broadcast %8 : vector<1x16xf32> to vector<4x16xf32>
    %10 = arith.mulf %5, %9 : vector<4x16xf32>
    %c0_2 = arith.constant 0 : index
    %c0_3 = arith.constant 0 : index
    %11 = vector.load %arg4[%c0_2, %c0_3] : memref<4x16xf32, #tpu.memory_space<vmem>>, vector<4x16xf32>
    tpu.vector_store %arg4[%c0_2, %c0_3], %10 {strides = array<i32>} : memref<4x16xf32, #tpu.memory_space<vmem>>, vector<4x16xf32>,
    %c0_4 = arith.constant 0 : index
    %c0_5 = arith.constant 0 : index
    %c0_6 = arith.constant 0 : index
    %12 = vector.load %arg2[%c0_4, %c0_5, %c0_6] : memref<4x16x32xf32, #tpu.memory_space<vmem>>, vector<4x16x32xf32>
    %13 = vector.shape_cast %10 : vector<4x16xf32> to vector<4x16x1xf32>
    %14 = vector.broadcast %13 : vector<4x16x1xf32> to vector<4x16x32xf32>
    %15 = arith.mulf %14, %12 : vector<4x16x32xf32>
    %c0_7 = arith.constant 0 : index
    %c0_8 = arith.constant 0 : index
    %c0_9 = arith.constant 0 : index
    %16 = vector.load %arg5[%c0_7, %c0_8, %c0_9] : memref<4x16x32xf32, #tpu.memory_space<vmem>>, vector<4x16x32xf32>
    tpu.vector_store %arg5[%c0_7, %c0_8, %c0_9], %15 {strides = array<i32>} : memref<4x16x32xf32, #tpu.memory_space<vmem>>, vector<4x16x32xf32>,
    %cst_10 = arith.constant dense<0.000000e+00> : vector<16x32xf32>
    %17 = vector.multi_reduction <add>, %15, %cst_10 [0] : vector<4x16x32xf32> to vector<16x32xf32>
    %c0_11 = arith.constant 0 : index
    %c0_12 = arith.constant 0 : index
    %18 = vector.load %arg3[%c0_11, %c0_12] : memref<16x32xf32, #tpu.memory_space<vmem>>, vector<16x32xf32>
    tpu.vector_store %arg3[%c0_11, %c0_12], %17 {strides = array<i32>} : memref<16x32xf32, #tpu.memory_space<vmem>>, vector<16x32xf32>,
    return
  }
  func.func @transform_0(%arg0: i32) -> (i32, i32) {
    %c0_i32 = arith.constant 0 : i32
    %c0_i32_0 = arith.constant 0 : i32
    return %c0_i32, %arg0 : i32, i32
  }
  func.func @transform_1(%arg0: i32) -> (i32, i32, i32) {
    %c0_i32 = arith.constant 0 : i32
    %c0_i32_0 = arith.constant 0 : i32
    %c0_i32_1 = arith.constant 0 : i32
    return %c0_i32, %arg0, %c0_i32_0 : i32, i32, i32
  }
  func.func @transform_2(%arg0: i32) -> (i32, i32) {
    %c0_i32 = arith.constant 0 : i32
    %c0_i32_0 = arith.constant 0 : i32
    return %arg0, %c0_i32 : i32, i32
  }
  func.func @transform_3(%arg0: i32) -> (i32, i32) {
    %c0_i32 = arith.constant 0 : i32
    %c0_i32_0 = arith.constant 0 : i32
    return %c0_i32, %arg0 : i32, i32
  }
  func.func @transform_4(%arg0: i32) -> (i32, i32, i32) {
    %c0_i32 = arith.constant 0 : i32
    %c0_i32_0 = arith.constant 0 : i32
    %c0_i32_1 = arith.constant 0 : i32
    return %c0_i32, %arg0, %c0_i32_0 : i32, i32, i32
  }
}

</mosaic_0001>

<bundles_post_ra>
// kernel: tpu_custom_call.1
= control target key start
LH: loop header
LB: loop body
LE: loop exit
PB: predicated region body
PF: predicated region fallthrough
CT: control target
= control target key end

     0   :  { %10 = vsyncpa [#allocation3], 0  ;;  %s461_s0 = inlined_call_operand.hbm [shape: f32[4,16], index: 0, kind: input, shape index: {}]   ;;  %s462_s1 = inlined_call_operand.hbm [shape: f32[4,16,32], index: 1, kind: input, shape index: {}]   ;;  %s463_s2 = inlined_call_operand.hbm [shape: f32[16,32], index: 2, kind: output, shape index: {0}]   ;;  %s464_s3 = inlined_call_operand.hbm [shape: f32[4,16], index: 3, kind: output, shape index: {1}]   ;;  %s465_s4 = inlined_call_operand.hbm [shape: f32[4,16,32], index: 4, kind: output, shape index: {2}]  }
   0x1   :  { %11 = vsyncpa [#allocation6], 0 }
   0x2   :  { %12 = vsyncpa [#allocation4], 0 }
   0x3   :  { %13 = vsyncpa [#allocation9], 0  ;;  %s325_s15 = smov [#allocation2]   ;;  %s326_s17 = smov [#allocation5]  }
   0x4   :  { %s20_s16 = sshll.u32 %s325_s15, 4  ;;  %s29_s18 = sshll.u32 %s326_s17, 4  ;;  %s21_s16 = int_to_ptr.vmem [resolvable:$true] %s20_s16  ;;  %s357_s18 = int_to_ptr.vmem [resolvable:$true] %s29_s18 }
   0x5   :  { %s207_s21 = scalar_lea.hbm %s461_s0, 64 }
   0x6   :  { %p208_p0 = scmp.ne.s32.totalorder %s461_s0, %s207_s21  ;;  %p211_p1 = scmp.lt.u32.totalorder %s207_s21, %s461_s0 }
   0x8   :  { %p213_p2 = pnand %p211_p1, %p208_p0 }
   0xa   :  { %216 = shalt.err (!%p213_p2)
}
   0xb   :  { %s217_s26 = scalar_lea.vmem %s21_s16, 64  ;;  %p222_p4 = scmp.lt.s32.totalorder %s21_s16, %s21_s16 }
   0xc   :  { %p218_p3 = scmp.ne.s32.totalorder %s21_s16, %s217_s26  ;;  %p223_p5 = scmp.lt.s32.totalorder %s217_s26, %s217_s26 }
   0xe   :  { %p224_p6 = por %p223_p5, %p222_p4 }
  0x10   :  { %p225_p7 = pnand %p224_p6, %p218_p3 }
  0x12   :  { %228 = shalt.err (!%p225_p7)
}
  0x13   :  { %23 = dma.hbm_to_vmem [thread:$0]  %s461_s0, 64, %s21_s16, [#allocation3]  }
  0x14   :  { %s229_s5 = scalar_lea.hbm %s462_s1, 1024 }
  0x15   :  { %p230_p8 = scmp.ne.s32.totalorder %s462_s1, %s229_s5  ;;  %p233_p9 = scmp.lt.u32.totalorder %s229_s5, %s462_s1 }
  0x17   :  { %p235_p10 = pnand %p233_p9, %p230_p8 }
  0x19   :  { %238 = shalt.err (!%p235_p10)
}
  0x1a   :  { %s239_s10 = scalar_lea.vmem %s357_s18, 1024  ;;  %p244_p12 = scmp.lt.s32.totalorder %s357_s18, %s357_s18 }
  0x1b   :  { %p240_p11 = scmp.ne.s32.totalorder %s357_s18, %s239_s10  ;;  %p245_p13 = scmp.lt.s32.totalorder %s239_s10, %s239_s10 }
  0x1d   :  { %p246_p0 = por %p245_p13, %p244_p12 }
  0x1f   :  { %p247_p1 = pnand %p246_p0, %p240_p11 }
  0x21   :  { %250 = shalt.err (!%p247_p1)
}
  0x22   :  { %s327_s0 = smov 128   ;;  %s328_s11 = smov 8  }
  0x23   :  { %35 = dma.hbm_to_vmem [thread:$0]  %s462_s1, 1024, %s357_s18, [#allocation6], %s327_s0, %s327_s0, %s328_s11  }
  0x24   :  { %317 = dma.done.wait [#allocation3], 64  }
  0x25   :  { %318 = vsyncadd [#allocation3], 4294967232 }
  0x26   :  { %319 = dma.done.wait [#allocation6], 1024  }
  0x27   :  { %320 = vsyncadd [#allocation6], 4294966272  ;;  %vm43_vm0 = vcmask 125952   ;;  %v42_v0 = vld [vmem:[#allocation2] sm:$0xf]  ;;  %v72_v18 = vlaneseq  ;;  %s329_s1 = smov [#allocation8]  }
  0x28   :  { %v44_v1 = vsel %vm43_vm0, %v42_v0, -inf  ;;  %s167_s14 = sshll.u32 %s329_s1, 4  ;;  %s168_s14 = int_to_ptr.vmem [resolvable:$true] %s167_s14 }
  0x29   :  { %v45_v2 = vrot.slane %v44_v1, 4  ;;  %v73_v19 = vshrl.u32 %v72_v18, 7  ;;  %s251_s15 = scalar_lea.vmem %s168_s14, 64  ;;  %p256_p3 = scmp.lt.s32.totalorder %s168_s14, %s168_s14 }
  0x2a   :  { %p252_p2 = scmp.ne.s32.totalorder %s168_s14, %s251_s15  ;;  %p257_p4 = scmp.lt.s32.totalorder %s251_s15, %s251_s15 }
  0x2b   :  { %v46_v3 = vmax.f32 %v44_v1, %v45_v2  ;;  %v85_v20 = vsub.s32 1, %v73_v19  ;;  %v74_v21 = vsub.s32 0, %v73_v19  ;;  %v96_v26 = vsub.s32 2, %v73_v19 }
  0x2c   :  { %v107_v28 = vsub.s32 3, %v73_v19  ;;  %p258_p5 = por %p257_p4, %p256_p3 }
  0x2d   :  { %v47_v4 = vrot.slane %v46_v3, 2 }
  0x2e   :  { %p259_p6 = pnand %p258_p5, %p252_p2 }
  0x2f   :  { %v48_v5 = vmax.f32 %v46_v3, %v47_v4 }
  0x31   :  { %v49_v6 = vrot.slane %v48_v5, 1 }
  0x33   :  { %v50_v7 = vmax.f32 %v48_v5, %v49_v6 }
  0x35   :  { %v51_v8 = vsub.f32 %v42_v0, %v50_v7 }
  0x37   :  { %v52_v9 = vmul.f32 1.442695, %v51_v8 }
  0x39   :  { %203 = vpow2.f32 %v52_v9 }
  0x43   :  { %v204_v10 = vpop.eup %203 }
  0x44   :  { %v54_v11 = vsel %vm43_vm0, %v204_v10, 0.0 }
  0x45   :  { %v55_v12 = vrot.slane %v54_v11, 4 }
  0x47   :  { %v56_v13 = vadd.f32 %v55_v12, %v54_v11 }
  0x49   :  { %v57_v14 = vrot.slane %v56_v13, 2 }
  0x4b   :  { %v58_v15 = vadd.f32 %v57_v14, %v56_v13 }
  0x4d   :  { %v59_v16 = vrot.slane %v58_v15, 1 }
  0x4f   :  { %v60_v17 = vadd.f32 %v59_v16, %v58_v15 }
  0x51   :  { %205 = vrcp.f32 %v60_v17 }
  0x5b   :  { %v206_v22 = vpop.eup %205 }
  0x5c   :  { %v62_v23 = vmul.f32 %v206_v22, %v204_v10 }
  0x5e   :  { %v86_v24 = vrot.slane %v62_v23, %v85_v20  ;;  %63 = vst.msk [vmem:[#allocation8] sm:$0xf] %vm43_vm0, %v62_v23  ;;  %v75_v25 = vrot.slane %v62_v23, %v74_v21  ;;  %v97_v27 = vrot.slane %v62_v23, %v96_v26 }
  0x60   :  { %88 = vbcast.lane.b32.xlu1 %v86_v24, 256  ;;  %77 = vbcast.lane.b32.xlu0 %v75_v25, 256 }
  0x64   :  { %92 = vbcast.lane.b32.xlu1 %v86_v24, 264  ;;  %81 = vbcast.lane.b32.xlu0 %v75_v25, 264 }
  0x65   :  { %262 = shalt.err (!%p259_p6)
}
  0x66   :  { %s263_s18 = scalar_lea.hbm %s464_s3, 64 }
  0x67   :  { %p264_p7 = scmp.ne.s32.totalorder %s464_s3, %s263_s18  ;;  %p267_p8 = scmp.lt.u32.totalorder %s263_s18, %s464_s3 }
  0x69   :  { %p269_p9 = pnand %p267_p8, %p264_p7 }
  0x6b   :  { %272 = shalt.err (!%p269_p9)
}
  0x6c   :  { %170 = dma.vmem_to_hbm [thread:$0]  %s168_s14, 64, %s464_s3, [#allocation9]   ;;  %103 = vbcast.lane.b32.xlu1 %v97_v27, 264  ;;  %99 = vbcast.lane.b32.xlu0 %v97_v27, 256  ;;  %v108_v29 = vrot.slane %v62_v23, %v107_v28  ;;  %v66_v30 = vld [vmem:[#allocation5 + $0x10] sm:$0xff]  ;;  %v64_v31 = vld [vmem:[#allocation5] sm:$0xff] }
  0x6d   :  { %vm124_vm1 = vcmask 261120   ;;  %v67_v36 = vld [vmem:[#allocation5 + $0x18] sm:$0xff]  ;;  %v65_v37 = vld [vmem:[#allocation5 + $0x8] sm:$0xff]  ;;  %v68_v43 = vld [vmem:[#allocation5 + $0x20] sm:$0xff]  ;;  %s330_s3 = smov [#allocation10]   ;;  %s331_s26 = smov [#allocation7]  }
  0x6e   :  { %v69_v42 = vld [vmem:[#allocation5 + $0x28] sm:$0xff]  ;;  %v71_v52 = vld [vmem:[#allocation5 + $0x38] sm:$0xff]  ;;  %v70_v53 = vld [vmem:[#allocation5 + $0x30] sm:$0xff]  ;;  %s176_s25 = sshll.u32 %s330_s3, 4  ;;  %s154_s27 = sshll.u32 %s331_s26, 4  ;;  %s177_s25 = int_to_ptr.vmem [resolvable:$true] %s176_s25  ;;  %s422_s27 = int_to_ptr.vmem [resolvable:$true] %s154_s27 }
  0x6f   :  { %s273_s28 = scalar_lea.vmem %s177_s25, 1024  ;;  %p278_p11 = scmp.lt.s32.totalorder %s177_s25, %s177_s25 }
  0x70   :  { %114 = vbcast.lane.b32.xlu1 %v108_v29, 264  ;;  %110 = vbcast.lane.b32.xlu0 %v108_v29, 256  ;;  %p274_p10 = scmp.ne.s32.totalorder %s177_s25, %s273_s28  ;;  %p279_p12 = scmp.lt.s32.totalorder %s273_s28, %s273_s28 }
  0x72   :  { %p280_p13 = por %p279_p12, %p278_p11 }
  0x74   :  { %p281_p0 = pnand %p280_p13, %p274_p10 }
  0xd2   :  { %v89_v32 = vpop.permute.xlu1 %88  ;;  %v78_v33 = vpop.permute.xlu0 %77 }
  0xd3   :  { %v118_v34 = vmul.f32 %v89_v32, %v66_v30  ;;  %v116_v35 = vmul.f32 %v78_v33, %v64_v31 }
  0xd5   :  { %127 = vst.msk [vmem:[#allocation10 + $0x10] sm:$0xff] %vm124_vm1, %v118_v34  ;;  %125 = vst.msk [vmem:[#allocation10] sm:$0xff] %vm124_vm1, %v116_v35  ;;  %v134_v44 = vsel %vm124_vm1, %v118_v34, 0.0  ;;  %v133_v45 = vsel %vm124_vm1, %v116_v35, 0.0 }
  0xd6   :  { %v93_v38 = vpop.permute.xlu1 %92  ;;  %v82_v39 = vpop.permute.xlu0 %81  ;;  %v135_v56 = vadd.f32 %v134_v44, %v133_v45 }
  0xd7   :  { %v119_v40 = vmul.f32 %v93_v38, %v67_v36  ;;  %v117_v41 = vmul.f32 %v82_v39, %v65_v37 }
  0xd9   :  { %128 = vst.msk [vmem:[#allocation10 + $0x18] sm:$0xff] %vm124_vm1, %v119_v40  ;;  %126 = vst.msk [vmem:[#allocation10 + $0x8] sm:$0xff] %vm124_vm1, %v117_v41  ;;  %v141_v48 = vsel %vm124_vm1, %v119_v40, 0.0  ;;  %v140_v49 = vsel %vm124_vm1, %v117_v41, 0.0 }
  0xda   :  { %v142_v57 = vadd.f32 %v141_v48, %v140_v49 }
  0xde   :  { %v104_v46 = vpop.permute.xlu1 %103  ;;  %v100_v47 = vpop.permute.xlu0 %99 }
  0xdf   :  { %v121_v50 = vmul.f32 %v104_v46, %v69_v42  ;;  %v120_v51 = vmul.f32 %v100_v47, %v68_v43 }
  0xe1   :  { %130 = vst.msk [vmem:[#allocation10 + $0x28] sm:$0xff] %vm124_vm1, %v121_v50  ;;  %v143_v54 = vsel %vm124_vm1, %v121_v50, 0.0  ;;  %129 = vst.msk [vmem:[#allocation10 + $0x20] sm:$0xff] %vm124_vm1, %v120_v51  ;;  %v136_v55 = vsel %vm124_vm1, %v120_v51, 0.0 }
  0xe2   :  { %v115_v58 = vpop.permute.xlu1 %114  ;;  %v111_v59 = vpop.permute.xlu0 %110  ;;  %v144_v62 = vadd.f32 %v143_v54, %v142_v57  ;;  %v137_v63 = vadd.f32 %v136_v55, %v135_v56 }
  0xe3   :  { %v123_v60 = vmul.f32 %v115_v58, %v71_v52  ;;  %v122_v61 = vmul.f32 %v111_v59, %v70_v53 }
  0xe5   :  { %132 = vst.msk [vmem:[#allocation10 + $0x38] sm:$0xff] %vm124_vm1, %v123_v60  ;;  %v145_v0 = vsel %vm124_vm1, %v123_v60, 0.0  ;;  %131 = vst.msk [vmem:[#allocation10 + $0x30] sm:$0xff] %vm124_vm1, %v122_v61  ;;  %v138_v1 = vsel %vm124_vm1, %v122_v61, 0.0 }
  0xe6   :  { %v146_v2 = vadd.f32 %v145_v0, %v144_v62  ;;  %v139_v3 = vadd.f32 %v138_v1, %v137_v63 }
  0xe7   :  { %284 = shalt.err (!%p281_p0)
}
  0xe8   :  { %s285_s5 = scalar_lea.hbm %s465_s4, 1024 }
  0xe9   :  { %p286_p1 = scmp.ne.s32.totalorder %s465_s4, %s285_s5  ;;  %p289_p2 = scmp.lt.u32.totalorder %s285_s5, %s465_s4 }
  0xeb   :  { %p291_p3 = pnand %p289_p2, %p286_p1 }
  0xed   :  { %294 = shalt.err (!%p291_p3)
}
  0xee   :  { %182 = dma.vmem_to_hbm [thread:$0]  %s177_s25, 1024, %s465_s4, [#allocation9], %s327_s0, %s327_s0, %s328_s11   ;;  %148 = vst.msk [vmem:[#allocation7 + $0x8] sm:$0xff] %vm124_vm1, %v146_v2  ;;  %147 = vst.msk [vmem:[#allocation7] sm:$0xff] %vm124_vm1, %v139_v3 }
  0xef   :  { %s295_s13 = scalar_lea.vmem %s422_s27, 256  ;;  %p300_p5 = scmp.lt.s32.totalorder %s422_s27, %s422_s27 }
  0xf0   :  { %p296_p4 = scmp.ne.s32.totalorder %s422_s27, %s295_s13  ;;  %p301_p6 = scmp.lt.s32.totalorder %s295_s13, %s295_s13 }
  0xf2   :  { %p302_p7 = por %p301_p6, %p300_p5 }
  0xf4   :  { %p303_p8 = pnand %p302_p7, %p296_p4 }
  0xf6   :  { %306 = shalt.err (!%p303_p8)
}
  0xf7   :  { %s307_s15 = scalar_lea.hbm %s463_s2, 256 }
  0xf8   :  { %p308_p9 = scmp.ne.s32.totalorder %s463_s2, %s307_s15  ;;  %p311_p10 = scmp.lt.u32.totalorder %s307_s15, %s463_s2 }
  0xfa   :  { %p313_p11 = pnand %p311_p10, %p308_p9 }
  0xfc   :  { %316 = shalt.err (!%p313_p11)
}
  0xfd   :  { %160 = dma.vmem_to_hbm [thread:$0]  %s422_s27, 256, %s463_s2, [#allocation4], %s327_s0, %s327_s0, %s328_s11  }
  0xfe   :  { %321 = dma.done.wait [#allocation4], 256  }
  0xff   :  { %322 = vsyncadd [#allocation4], 4294967040 }
 0x100   :  { %323 = dma.done.wait [#allocation9], 1088  }
 0x101   :  { %324 = vsyncadd [#allocation9], 4294966208 }
 0x102   :  { %192 = vsyncpa [#allocation3], 1 }
 0x103   :  { %193 = vsyncpa [#allocation6], 1 }
 0x104   :  { %194 = vsyncpa [#allocation4], 1 }
 0x105   :  { %195 = vsyncpa [#allocation9], 1 }

</bundles_post_ra>
